<compile_context>
chip_gen: v7x
topology: tpu7x:2x2x1
jax: 0.10.0
libtpu: 0.0.40
codegen_flags: <defaults>
</compile_context>

<pallas_src>
import jax
import jax.numpy as jnp
from jax.experimental import pallas as pl
from jax.experimental.pallas import tpu as pltpu


def _cdiv(a, b):
    return (a + b - 1) // b


def _round_up(x, m):
    return _cdiv(x, m) * m


def _choose_tile(dim, tile_max, align):
    """Pick (tile, padded_extent): tile is a multiple of `align`, <= tile_max
    (unless the whole padded dim fits in one tile), tile divides padded_extent,
    and padding waste stays below one `align` unit per block."""
    padded0 = _round_up(max(dim, 1), align)
    if padded0 <= tile_max:
        return padded0, padded0
    n_blocks = _cdiv(padded0, tile_max)
    tile = _round_up(_cdiv(padded0, n_blocks), align)
    return tile, tile * n_blocks


# ------------------------------------------------------------------ kernels --

def _bp_kernel_single_k(coef_ref, x_ref, w_ref, o_ref):
    """K fits in one tile: compute and scale the output tile directly."""
    acc = jnp.dot(
        x_ref[...].astype(w_ref.dtype),       # bf16 activations for the MXU
        w_ref[...],
        preferred_element_type=jnp.float32,   # f32 accumulation
    )
    o_ref[...] = acc * coef_ref[0]


def _bp_kernel_acc(coef_ref, x_ref, w_ref, o_ref):
    """K split over grid axis 2: accumulate straight into the f32 output."""
    k = pl.program_id(2)

    @pl.when(k == 0)
    def _():
        o_ref[...] = jnp.zeros_like(o_ref)

    o_ref[...] += jnp.dot(
        x_ref[...].astype(w_ref.dtype),
        w_ref[...],
        preferred_element_type=jnp.float32,
    )

    @pl.when(k == pl.num_programs(2) - 1)
    def _():
        o_ref[...] *= coef_ref[0]


# -------------------------------------------------------------- pallas call --

def back_proj_pallas(x, wt, coef, tk, tn, *, tm_max=128):
    """Returns out_padded[Mp, Np] = (x_padded @ wt) * coef (f32).

    x:    (M, K) float32 activations (zero-padded here to (Mp, Kp)).
    wt:   (Kp, Np) pre-transposed/padded weight (bf16 or f32), Kp % tk == 0,
          Np % tn == 0.
    coef: (1,) float32 array -> SMEM scalar.
    """
    M, K = x.shape
    Kp, Np = wt.shape
    assert Kp % tk == 0 and Np % tn == 0 and K <= Kp

    tm, Mp = _choose_tile(M, tm_max, 8)
    if (Mp, Kp) != (M, K):
        x = jnp.pad(x, ((0, Mp - M), (0, Kp - K)))   # zero pad along K: exact

    nm, nn, nk = Mp // tm, Np // tn, Kp // tk
    coef_spec = pl.BlockSpec(memory_space=pltpu.MemorySpace.SMEM)

    if nk == 1:
        kernel = _bp_kernel_single_k
        grid = (nm, nn)
        in_specs = [
            coef_spec,
            pl.BlockSpec((tm, tk), lambda i, j: (i, 0)),
            pl.BlockSpec((tk, tn), lambda i, j: (0, j)),
        ]
        out_spec = pl.BlockSpec((tm, tn), lambda i, j: (i, j))
        dims = ("parallel", "parallel")
    else:
        kernel = _bp_kernel_acc
        grid = (nm, nn, nk)
        in_specs = [
            coef_spec,
            pl.BlockSpec((tm, tk), lambda i, j, k: (i, k)),
            pl.BlockSpec((tk, tn), lambda i, j, k: (k, j)),
        ]
        out_spec = pl.BlockSpec((tm, tn), lambda i, j, k: (i, j))
        dims = ("parallel", "parallel", "arbitrary")

    return pl.pallas_call(
        kernel,
        out_shape=jax.ShapeDtypeStruct((Mp, Np), jnp.float32),
        grid_spec=pltpu.PrefetchScalarGridSpec(
            num_scalar_prefetch=0,
            grid=grid,
            in_specs=in_specs,
            out_specs=out_spec,
        ),
        compiler_params=pltpu.CompilerParams(dimension_semantics=dims),
    )(coef, x, wt)


# ----------------------------------------------------------- module wrapper --

def init_back_proj(weight_dense, image_size, coef, *,
                   weight_dtype=jnp.bfloat16, tk_max=1024, tn_max=2048):
    """One-time setup mirroring back_proj_net.__init__ (learn=False path).

    weight_dense: dense (N, K) system matrix as stored by the torch module
                  after .t() (rows = image pixels, cols = h*w), nonzeros == 1.
    """
    N, K = weight_dense.shape
    tk, Kp = _choose_tile(K, tk_max, 128)
    tn, Np = _choose_tile(N, tn_max, 128)
    # One-time transpose + lossless bf16 cast (values are exactly 0/1) + pad.
    wt = weight_dense.T.astype(weight_dtype)
    wt = jnp.pad(wt, ((0, Kp - K), (0, Np - N)))
    return {
        "wt": wt,
        "K": K,
        "N": N,
        "tk": tk,
        "tn": tn,
        "coef": jnp.asarray(coef, jnp.float32).reshape(1),
        "image_size": tuple(image_size),
        "bias": None,   # learn=False => no bias, weight values are 1.0
    }


def back_proj_net_forward(params, p):
    """JAX/Pallas equivalent of back_proj_net.forward (learn=False path)."""
    b, c, h, w = p.shape
    M, K = b * c, h * w
    assert K == params["K"], "sinogram size does not match system matrix"
    x = p.reshape(M, K).astype(jnp.float32)
    out = back_proj_pallas(x, params["wt"], params["coef"],
                           params["tk"], params["tn"])
    out = out[:M, :params["N"]]
    if params["bias"] is not None:
        out = out + params["bias"]
    return out.reshape(b, c, *params["image_size"])


if __name__ == "__main__":
    key = jax.random.PRNGKey(0)

    # Sinogram (b=2, c=4, n_angles=16, n_det=16); reconstructed image 16x16.
    b, c, h, w = 2, 4, 16, 16
    image_size = (16, 16)
    M, K = b * c, h * w                       # 8, 256
    N = image_size[0] * image_size[1]         # 256
    coef = 0.5

    k_p, k_mask = jax.random.split(key)
    p = jax.random.normal(k_p, (b, c, h, w), dtype=jnp.float32)

    # Deterministic synthetic "sparse" system matrix (learn=False path):
    # sparse structure with all stored values filled to 1.0, densified here.
    mask = jax.random.uniform(k_mask, (N, K)) < 0.1
    weight_dense = mask.astype(jnp.float32)   # (N, K), values in {0, 1}

    params = init_back_proj(weight_dense, image_size, coef)
    out = back_proj_net_forward(params, p)
    out = jax.block_until_ready(out)
    assert out.shape == (b, c, *image_size)

    # Reference checks.  The kernel feeds bf16 activations to the MXU (weights
    # are bf16-exact), so compare tightly against the bf16-rounded-activation
    # reference and loosely against the pure f32 reference.
    x = p.reshape(M, K)
    ref_f32 = (x @ weight_dense.T * coef).reshape(b, c, *image_size)
    x_bf = x.astype(jnp.bfloat16).astype(jnp.float32)
    ref_bf = (x_bf @ weight_dense.T * coef).reshape(b, c, *image_size)
    assert jnp.allclose(out, ref_bf, atol=1e-4, rtol=1e-4)
    assert jnp.allclose(out, ref_f32, atol=6e-2, rtol=2e-2)

    print("KERNEL_OK")
</pallas_src>

<mosaic_0001>
module attributes {stable_mosaic.version = 11 : i64} {
  func.func @_bp_kernel_single_k(%arg0: i32, %arg1: i32, %arg2: memref<1xf32, #tpu.memory_space<smem>>, %arg3: memref<8x256xf32, #tpu.memory_space<vmem>>, %arg4: memref<256x256xbf16, #tpu.memory_space<vmem>>, %arg5: memref<8x256xf32, #tpu.memory_space<vmem>>) attributes {dimension_semantics = [#tpu.dimension_semantics<parallel>, #tpu.dimension_semantics<parallel>], iteration_bounds = array<i64: 1, 1>, scalar_prefetch = 0 : i64, scratch_operands = 0 : i64, tpu.core_type = #tpu.core_type<tc>, window_params = [{transform_indices = @transform_0, window_bounds = array<i64: 1>}, {transform_indices = @transform_1, window_bounds = array<i64: 8, 256>}, {transform_indices = @transform_2, window_bounds = array<i64: 256, 256>}, {transform_indices = @transform_3, window_bounds = array<i64: 8, 256>}]} {
    %c0 = arith.constant 0 : index
    %c0_0 = arith.constant 0 : index
    %0 = vector.load %arg3[%c0, %c0_0] : memref<8x256xf32, #tpu.memory_space<vmem>>, vector<8x256xf32>
    %1 = arith.truncf %0 : vector<8x256xf32> to vector<8x256xbf16>
    %c0_1 = arith.constant 0 : index
    %c0_2 = arith.constant 0 : index
    %2 = vector.load %arg4[%c0_1, %c0_2] : memref<256x256xbf16, #tpu.memory_space<vmem>>, vector<256x256xbf16>
    %cst = arith.constant dense<0.000000e+00> : vector<8x256xf32>
    %3 = tpu.matmul %1, %2, %cst {dimension_numbers = #tpu.dot_dimension_numbers<[1], [0], [0], [1], [0, 0, 1, 1], [], []>} : vector<8x256xbf16>, vector<256x256xbf16>, vector<8x256xf32> -> vector<8x256xf32>
    %c0_3 = arith.constant 0 : index
    %4 = memref.load %arg2[%c0_3] : memref<1xf32, #tpu.memory_space<smem>>
    %5 = vector.broadcast %4 : f32 to vector<8x256xf32>
    %6 = arith.mulf %3, %5 : vector<8x256xf32>
    %c0_4 = arith.constant 0 : index
    %c0_5 = arith.constant 0 : index
    %7 = vector.load %arg5[%c0_4, %c0_5] : memref<8x256xf32, #tpu.memory_space<vmem>>, vector<8x256xf32>
    tpu.vector_store %arg5[%c0_4, %c0_5], %6 {strides = array<i32>} : memref<8x256xf32, #tpu.memory_space<vmem>>, vector<8x256xf32>,
    return
  }
  func.func @transform_0(%arg0: i32, %arg1: i32) -> i32 {
    %c0_i32 = arith.constant 0 : i32
    %c0_i32_0 = arith.constant 0 : i32
    return %c0_i32 : i32
  }
  func.func @transform_1(%arg0: i32, %arg1: i32) -> (i32, i32) {
    %c0_i32 = arith.constant 0 : i32
    %c0_i32_0 = arith.constant 0 : i32
    return %arg0, %c0_i32 : i32, i32
  }
  func.func @transform_2(%arg0: i32, %arg1: i32) -> (i32, i32) {
    %c0_i32 = arith.constant 0 : i32
    %c0_i32_0 = arith.constant 0 : i32
    return %c0_i32, %arg1 : i32, i32
  }
  func.func @transform_3(%arg0: i32, %arg1: i32) -> (i32, i32) {
    %c0_i32 = arith.constant 0 : i32
    return %arg0, %arg1 : i32, i32
  }
}

</mosaic_0001>

<bundles_post_ra>
// kernel: tpu_custom_call.1
= control target key start
LH: loop header
LB: loop body
LE: loop exit
PB: predicated region body
PF: predicated region fallthrough
CT: control target
= control target key end

     0   :  { %9 = vsyncpa [#allocation4], 0  ;;  %s529_s0 = inlined_call_operand.<no memory space> [shape: f32[1], index: 0, kind: input, shape index: {}]   ;;  %s530_s1 = inlined_call_operand.hbm [shape: f32[8,256], index: 1, kind: input, shape index: {}]   ;;  %s531_s2 = inlined_call_operand.hbm [shape: bf16[256,256], index: 2, kind: input, shape index: {}]   ;;  %s532_s3 = inlined_call_operand.hbm [shape: f32[8,256], index: 3, kind: output, shape index: {}]  }
   0x1   :  { %10 = vsyncpa [#allocation7], 0 }
   0x2   :  { %11 = vsyncpa [#allocation5], 0  ;;  %s458_s12 = smov [#allocation3]   ;;  %s459_s14 = smov [#allocation6]  }
   0x3   :  { %s20_s13 = sshll.u32 %s458_s12, 4  ;;  %s29_s15 = sshll.u32 %s459_s14, 4  ;;  %s21_s13 = int_to_ptr.vmem [resolvable:$true] %s20_s13  ;;  %s483_s15 = int_to_ptr.vmem [resolvable:$true] %s29_s15 }
   0x4   :  { %s386_s18 = scalar_lea.hbm %s530_s1, 256 }
   0x5   :  { %p387_p0 = scmp.ne.s32.totalorder %s530_s1, %s386_s18  ;;  %p390_p1 = scmp.lt.u32.totalorder %s386_s18, %s530_s1 }
   0x7   :  { %p392_p2 = pnand %p390_p1, %p387_p0 }
   0x9   :  { %395 = shalt.err (!%p392_p2)
}
   0xa   :  { %s396_s23 = scalar_lea.vmem %s21_s13, 256  ;;  %p401_p4 = scmp.lt.s32.totalorder %s21_s13, %s21_s13 }
   0xb   :  { %p397_p3 = scmp.ne.s32.totalorder %s21_s13, %s396_s23  ;;  %p402_p5 = scmp.lt.s32.totalorder %s396_s23, %s396_s23 }
   0xd   :  { %p403_p6 = por %p402_p5, %p401_p4 }
   0xf   :  { %p404_p7 = pnand %p403_p6, %p397_p3 }
  0x11   :  { %407 = shalt.err (!%p404_p7)
}
  0x12   :  { %23 = dma.hbm_to_vmem [thread:$0]  %s530_s1, 256, %s21_s13, [#allocation4]  }
  0x13   :  { %s408_s28 = scalar_lea.hbm %s531_s2, 4096 }
  0x14   :  { %p409_p8 = scmp.ne.s32.totalorder %s531_s2, %s408_s28  ;;  %p412_p9 = scmp.lt.u32.totalorder %s408_s28, %s531_s2 }
  0x16   :  { %p414_p10 = pnand %p412_p9, %p409_p8 }
  0x18   :  { %417 = shalt.err (!%p414_p10)
}
  0x19   :  { %s418_s6 = scalar_lea.vmem %s483_s15, 4096  ;;  %p423_p12 = scmp.lt.s32.totalorder %s483_s15, %s483_s15 }
  0x1a   :  { %p419_p11 = scmp.ne.s32.totalorder %s483_s15, %s418_s6  ;;  %p424_p13 = scmp.lt.s32.totalorder %s418_s6, %s418_s6 }
  0x1c   :  { %p425_p0 = por %p424_p13, %p423_p12 }
  0x1e   :  { %p426_p1 = pnand %p425_p0, %p419_p11 }
  0x20   :  { %429 = shalt.err (!%p426_p1)
}
  0x21   :  { %s460_s1 = smov 128   ;;  %s461_s7 = smov 8  }
  0x22   :  { %35 = dma.hbm_to_vmem [thread:$0]  %s531_s2, 4096, %s483_s15, [#allocation7], %s460_s1, %s460_s1, %s461_s7  }
  0x23   :  { %452 = dma.done.wait [#allocation4], 256  }
  0x24   :  { %453 = vsyncadd [#allocation4], 4294967040 }
  0x25   :  { %454 = dma.done.wait [#allocation7], 4096  }
  0x26   :  { %455 = vsyncadd [#allocation7], 4294963200  ;;  %v338_v0 = vld [vmem:[#allocation6 + $0x4] ss:$8 sps:$4 sm:$0xff]   ;;  %v340_v1 = vld [vmem:[#allocation6] ss:$8 sps:$4 sm:$0xff]   ;;  %v280_v36 = vstv %s529_s0 }
  0x27   :  { %238 = vmatprep.subr.bf16.mxu0 %v338_v0  ;;  %v341_v2 = vld [vmem:[#allocation6 + $0x14] ss:$8 sps:$4 sm:$0xff]   ;;  %v343_v3 = vld [vmem:[#allocation6 + $0x10] ss:$8 sps:$4 sm:$0xff]   ;;  %v344_v4 = vld [vmem:[#allocation6 + $0x24] ss:$8 sps:$4 sm:$0xff]  }
  0x28   :  { %239 = vmatpush1.bf16.msra.mxu0 %v340_v1  ;;  %v346_v5 = vld [vmem:[#allocation6 + $0x20] ss:$8 sps:$4 sm:$0xff]   ;;  %v347_v6 = vld [vmem:[#allocation6 + $0x34] ss:$8 sps:$4 sm:$0xff]   ;;  %v349_v7 = vld [vmem:[#allocation6 + $0x30] ss:$8 sps:$4 sm:$0xff]  }
  0x29   :  { %240 = vmatprep.subr.bf16.mxu0 %v341_v2  ;;  %v350_v8 = vld [vmem:[#allocation6 + $0x44] ss:$8 sps:$4 sm:$0xff]   ;;  %v352_v9 = vld [vmem:[#allocation6 + $0x40] ss:$8 sps:$4 sm:$0xff]   ;;  %v353_v10 = vld [vmem:[#allocation6 + $0x54] ss:$8 sps:$4 sm:$0xff]  }
  0x2a   :  { %v355_v11 = vld [vmem:[#allocation6 + $0x50] ss:$8 sps:$4 sm:$0xff]   ;;  %v356_v12 = vld [vmem:[#allocation6 + $0x64] ss:$8 sps:$4 sm:$0xff]   ;;  %v358_v15 = vld [vmem:[#allocation6 + $0x60] ss:$8 sps:$4 sm:$0xff]  }
  0x2b   :  { %v43_v13 = vld [vmem:[#allocation3 + $0x8] sm:$0xff]  ;;  %v362_v18 = vld [vmem:[#allocation6 + $0x84] ss:$8 sps:$4 sm:$0xff]   ;;  %v364_v19 = vld [vmem:[#allocation6 + $0x80] ss:$8 sps:$4 sm:$0xff]   ;;  %s462_s11 = smov [#allocation8]  }
  0x2c   :  { %241 = vmatpush1.bf16.msra.mxu0 %v343_v3  ;;  %v45_v14 = vpack.c.bf16 %v43_v13, %v43_v13  ;;  %v359_v16 = vld [vmem:[#allocation6 + $0x74] ss:$8 sps:$4 sm:$0xff]   ;;  %v361_v17 = vld [vmem:[#allocation6 + $0x70] ss:$8 sps:$4 sm:$0xff]   ;;  %v368_v22 = vld [vmem:[#allocation6 + $0xa4] ss:$8 sps:$4 sm:$0xff]  }
  0x2d   :  { %242 = vmatprep.subr.bf16.mxu0 %v344_v4  ;;  %v365_v20 = vld [vmem:[#allocation6 + $0x94] ss:$8 sps:$4 sm:$0xff]   ;;  %v367_v21 = vld [vmem:[#allocation6 + $0x90] ss:$8 sps:$4 sm:$0xff]   ;;  %v370_v23 = vld [vmem:[#allocation6 + $0xa0] ss:$8 sps:$4 sm:$0xff]  }
  0x2e   :  { %270 = vmatprep.mubr.bf16.mxu0 %v45_v14  ;;  %v371_v24 = vld [vmem:[#allocation6 + $0xb4] ss:$8 sps:$4 sm:$0xff]   ;;  %v373_v25 = vld [vmem:[#allocation6 + $0xb0] ss:$8 sps:$4 sm:$0xff]   ;;  %v374_v26 = vld [vmem:[#allocation6 + $0xc4] ss:$8 sps:$4 sm:$0xff]  }
  0x2f   :  { %v376_v27 = vld [vmem:[#allocation6 + $0xc0] ss:$8 sps:$4 sm:$0xff]   ;;  %v377_v28 = vld [vmem:[#allocation6 + $0xd4] ss:$8 sps:$4 sm:$0xff]   ;;  %v379_v29 = vld [vmem:[#allocation6 + $0xd0] ss:$8 sps:$4 sm:$0xff]  }
  0x30   :  { %243 = vmatpush1.bf16.msra.mxu0 %v346_v5  ;;  %v380_v30 = vld [vmem:[#allocation6 + $0xe4] ss:$8 sps:$4 sm:$0xff]   ;;  %v382_v31 = vld [vmem:[#allocation6 + $0xe0] ss:$8 sps:$4 sm:$0xff]   ;;  %v383_v32 = vld [vmem:[#allocation6 + $0xf4] ss:$8 sps:$4 sm:$0xff]  }
  0x31   :  { %244 = vmatprep.subr.bf16.mxu0 %v347_v6  ;;  %v385_v33 = vld [vmem:[#allocation6 + $0xf0] ss:$8 sps:$4 sm:$0xff]   ;;  %s291_s12 = sshll.u32 %s462_s11, 4  ;;  %s292_s12 = int_to_ptr.vmem [resolvable:$true] %s291_s12 }
  0x32   :  { %v42_v34 = vld [vmem:[#allocation3] sm:$0xff]  ;;  %s430_s13 = scalar_lea.vmem %s292_s12, 256  ;;  %p435_p3 = scmp.lt.s32.totalorder %s292_s12, %s292_s12 }
  0x33   :  { %v44_v35 = vpack.c.bf16 %v42_v34, %v42_v34  ;;  %p431_p2 = scmp.ne.s32.totalorder %s292_s12, %s430_s13  ;;  %p436_p4 = scmp.lt.s32.totalorder %s430_s13, %s430_s13 }
  0x34   :  { %245 = vmatpush1.bf16.msra.mxu0 %v349_v7 }
  0x35   :  { %246 = vmatprep.subr.bf16.mxu0 %v350_v8  ;;  %p437_p5 = por %p436_p4, %p435_p3 }
  0x37   :  { %p438_p6 = pnand %p437_p5, %p431_p2 }
  0x38   :  { %247 = vmatpush1.bf16.msra.mxu0 %v352_v9 }
  0x39   :  { %248 = vmatprep.subr.bf16.mxu0 %v353_v10 }
  0x3c   :  { %249 = vmatpush1.bf16.msra.mxu0 %v355_v11 }
  0x3d   :  { %250 = vmatprep.subr.bf16.mxu0 %v356_v12 }
  0x40   :  { %251 = vmatpush1.bf16.msra.mxu0 %v358_v15 }
  0x41   :  { %252 = vmatprep.subr.bf16.mxu0 %v359_v16 }
  0x44   :  { %253 = vmatpush1.bf16.msra.mxu0 %v361_v17 }
  0x45   :  { %254 = vmatprep.subr.bf16.mxu0 %v362_v18 }
  0x48   :  { %255 = vmatpush1.bf16.msra.mxu0 %v364_v19 }
  0x49   :  { %256 = vmatprep.subr.bf16.mxu0 %v365_v20 }
  0x4c   :  { %257 = vmatpush1.bf16.msra.mxu0 %v367_v21 }
  0x4d   :  { %258 = vmatprep.subr.bf16.mxu0 %v368_v22 }
  0x50   :  { %259 = vmatpush1.bf16.msra.mxu0 %v370_v23 }
  0x51   :  { %260 = vmatprep.subr.bf16.mxu0 %v371_v24 }
  0x54   :  { %261 = vmatpush1.bf16.msra.mxu0 %v373_v25 }
  0x55   :  { %262 = vmatprep.subr.bf16.mxu0 %v374_v26 }
  0x58   :  { %263 = vmatpush1.bf16.msra.mxu0 %v376_v27 }
  0x59   :  { %264 = vmatprep.subr.bf16.mxu0 %v377_v28 }
  0x5c   :  { %265 = vmatpush1.bf16.msra.mxu0 %v379_v29 }
  0x5d   :  { %266 = vmatprep.subr.bf16.mxu0 %v380_v30 }
  0x60   :  { %267 = vmatpush1.bf16.msra.mxu0 %v382_v31 }
  0x61   :  { %268 = vmatprep.subr.bf16.mxu0 %v383_v32 }
  0x64   :  { %269 = vmatpush1.bf16.msra.mxu0 %v385_v33 }
  0x67   :  { %271 = vmatmul.mubr.bf16.vlgmr.msra.gmra.mrb[0].mxu0 %v44_v35 }
 0x13a   :  { %v272_v37 = vpop.f32.mrb[0].mxu0 }
 0x13b   :  { %v281_v38 = vmul.f32 %v280_v36, %v272_v37  ;;  %v274_v39 = vpop.f32.mrb[1].mxu0 }
 0x13c   :  { %v282_v40 = vmul.f32 %v280_v36, %v274_v39  ;;  %v276_v41 = vpop.f32.mrb[2].mxu0 }
 0x13d   :  { %283 = vst [vmem:[#allocation8] sm:$0xff] %v281_v38  ;;  %v277_v42 = vpop.f32.mrb[3].mxu0 }
 0x13e   :  { %284 = vst [vmem:[#allocation8 + $0x8] sm:$0xff] %v282_v40 }
 0x13f   :  { %441 = shalt.err (!%p438_p6)
}
 0x140   :  { %s442_s15 = scalar_lea.hbm %s532_s3, 256 }
 0x141   :  { %p443_p7 = scmp.ne.s32.totalorder %s532_s3, %s442_s15  ;;  %p446_p8 = scmp.lt.u32.totalorder %s442_s15, %s532_s3 }
 0x143   :  { %p448_p9 = pnand %p446_p8, %p443_p7 }
 0x145   :  { %451 = shalt.err (!%p448_p9)
}
 0x146   :  { %294 = dma.vmem_to_hbm [thread:$0]  %s292_s12, 256, %s532_s3, [#allocation5]  }
 0x147   :  { %456 = dma.done.wait [#allocation5], 256  }
 0x148   :  { %457 = vsyncadd [#allocation5], 4294967040 }
 0x149   :  { %298 = vsyncpa [#allocation4], 1 }
 0x14a   :  { %299 = vsyncpa [#allocation7], 1 }
 0x14b   :  { %300 = vsyncpa [#allocation5], 1 }

</bundles_post_ra>
